<compile_context>
chip_gen: v6e
topology: v6e:2x2x1
jax: 0.10.0
libtpu: 0.0.40
codegen_flags: <defaults>
</compile_context>

<pallas_src>
import functools
import math

import jax
import jax.numpy as jnp
from jax.experimental import pallas as pl
from jax.experimental.pallas import tpu as pltpu


def _pairwise_kernel(pos_ref, neg_ref, out_ref, *, margin):
    # tanh in f32 regardless of input dtype (v5e EUP has no bf16 path).
    p = jnp.tanh(pos_ref[...].astype(jnp.float32))
    n = jnp.tanh(neg_ref[...].astype(jnp.float32))
    # MarginRankingLoss with target == 1: max(0, -(p - n) + margin)
    out_ref[...] = jnp.maximum(margin + n - p, 0.0).astype(out_ref.dtype)


def _round_up(x, m):
    return ((x + m - 1) // m) * m


_LANE_CANDIDATES = (1024, 512, 256, 128)
_TARGET_TILE_BYTES = 4 << 20          # ~4 MiB per-operand tile (v6e/v7x sweet spot)
_MIN_GRID_BLOCKS = 8                  # keep both v7x TCs busy / balanced


def _launch(pos2d, neg2d, margin, rows, lane, dtype):
    itemsize = jnp.dtype(dtype).itemsize

    # --- block_rows selection: balance grid first, then cap tile size ---
    row_target = max(8, (_TARGET_TILE_BYTES // (lane * itemsize)) // 8 * 8)
    if rows <= 8:
        block_rows = rows                                   # full array (exception to (8,128) rule)
    else:
        balanced = max(8, _round_up(pl.cdiv(rows, _MIN_GRID_BLOCKS), 8))
        block_rows = min(row_target, balanced, _round_up(rows, 8))

    grid = (pl.cdiv(rows, block_rows),)                     # Pallas handles partial last block
    spec = pl.BlockSpec((block_rows, lane), lambda i: (i, 0))

    tile_bytes = block_rows * lane * itemsize
    # 3 arrays x 2 pipeline buffers + headroom; raise v5e's 16 MiB default, stay
    # well under v7x's 64 MiB physical VMEM.
    vmem_limit = min(48 << 20, max(32 << 20, 6 * tile_bytes + (8 << 20)))

    touched = rows * lane
    cost = pl.CostEstimate(
        flops=3 * touched,
        transcendentals=2 * touched,
        bytes_accessed=3 * touched * itemsize,               # 2 in + 1 out, same dtype
    )

    kernel = functools.partial(_pairwise_kernel, margin=float(margin))

    return pl.pallas_call(
        kernel,
        out_shape=jax.ShapeDtypeStruct((rows, lane), dtype),
        grid_spec=pltpu.PrefetchScalarGridSpec(
            num_scalar_prefetch=0,
            grid=grid,
            in_specs=[spec, spec],
            out_specs=spec,
        ),
        compiler_params=pltpu.CompilerParams(
            dimension_semantics=("parallel",),
            vmem_limit_bytes=vmem_limit,
        ),
        cost_estimate=cost,
    )(pos2d, neg2d)


def pairwise_loss(pos_score, neg_score, margin=1.0):
    assert pos_score.shape == neg_score.shape, "pos/neg shape mismatch"
    assert pos_score.dtype == neg_score.dtype, "pos/neg dtype mismatch"
    orig_shape = pos_score.shape
    dtype = pos_score.dtype
    total = math.prod(orig_shape) if orig_shape else 1

    # ---------- fast path: no pad, no slice (free reshapes only) ----------
    if total % 128 == 0:
        lane = next(l for l in _LANE_CANDIDATES if total % l == 0)
        rows = total // lane
        pos2d = pos_score.reshape(rows, lane)
        neg2d = neg_score.reshape(rows, lane)
        out2d = _launch(pos2d, neg2d, margin, rows, lane, dtype)
        return out2d.reshape(orig_shape)

    # ---------- ragged path: pad only up to a multiple of LANE ----------
    lane = 1024 if total >= 1024 else 128
    padded_total = _round_up(total, lane)
    rows = padded_total // lane
    pos2d = jnp.pad(pos_score.reshape(-1), (0, padded_total - total)).reshape(rows, lane)
    neg2d = jnp.pad(neg_score.reshape(-1), (0, padded_total - total)).reshape(rows, lane)
    out2d = _launch(pos2d, neg2d, margin, rows, lane, dtype)
    return out2d.reshape(-1)[:total].reshape(orig_shape)


def pairwise_loss_ref(pos_score, neg_score, margin=1.0):
    p = jnp.tanh(pos_score)
    n = jnp.tanh(neg_score)
    return jnp.maximum(-(p - n) + margin, 0.0)


if __name__ == "__main__":
    key = jax.random.PRNGKey(0)
    k1, k2 = jax.random.split(key)
    B, N = 8, 128
    pos = jax.random.normal(k1, (B, N), dtype=jnp.float32)
    neg = jax.random.normal(k2, (B, N), dtype=jnp.float32)

    out = pairwise_loss(pos, neg, margin=1.0)
    out = jax.block_until_ready(out)

    ref = pairwise_loss_ref(pos, neg, margin=1.0)
    assert out.shape == (B, N)
    assert jnp.allclose(out, ref, atol=1e-5, rtol=1e-5), "mismatch vs reference"

    # Also exercise the ragged (padding) path once for coverage.
    pos_r = jax.random.normal(k1, (5, 37), dtype=jnp.float32)
    neg_r = jax.random.normal(k2, (5, 37), dtype=jnp.float32)
    out_r = jax.block_until_ready(pairwise_loss(pos_r, neg_r, margin=0.5))
    ref_r = pairwise_loss_ref(pos_r, neg_r, margin=0.5)
    assert out_r.shape == (5, 37)
    assert jnp.allclose(out_r, ref_r, atol=1e-5, rtol=1e-5), "mismatch vs reference (ragged)"

    print("KERNEL_OK")
</pallas_src>

<mosaic_0001>
module attributes {stable_mosaic.version = 11 : i64} {
  func.func @_pairwise_kernel(%arg0: i32, %arg1: memref<1x1024xf32, #tpu.memory_space<vmem>>, %arg2: memref<1x1024xf32, #tpu.memory_space<vmem>>, %arg3: memref<1x1024xf32, #tpu.memory_space<vmem>>) attributes {dimension_semantics = [#tpu.dimension_semantics<parallel>], iteration_bounds = array<i64: 1>, scalar_prefetch = 0 : i64, scratch_operands = 0 : i64, tpu.core_type = #tpu.core_type<tc>, window_params = [{transform_indices = @transform_0, window_bounds = array<i64: 1, 1024>}, {transform_indices = @transform_1, window_bounds = array<i64: 1, 1024>}, {transform_indices = @transform_2, window_bounds = array<i64: 1, 1024>}]} {
    %c0 = arith.constant 0 : index
    %c0_0 = arith.constant 0 : index
    %0 = vector.load %arg1[%c0, %c0_0] : memref<1x1024xf32, #tpu.memory_space<vmem>>, vector<1x1024xf32>
    %1 = math.tanh %0 : vector<1x1024xf32>
    %c0_1 = arith.constant 0 : index
    %c0_2 = arith.constant 0 : index
    %2 = vector.load %arg2[%c0_1, %c0_2] : memref<1x1024xf32, #tpu.memory_space<vmem>>, vector<1x1024xf32>
    %3 = math.tanh %2 : vector<1x1024xf32>
    %cst = arith.constant 1.000000e+00 : f32
    %4 = vector.broadcast %cst : f32 to vector<1x1024xf32>
    %5 = arith.addf %4, %3 : vector<1x1024xf32>
    %6 = arith.subf %5, %1 : vector<1x1024xf32>
    %cst_3 = arith.constant 0.000000e+00 : f32
    %7 = vector.broadcast %cst_3 : f32 to vector<1x1024xf32>
    %8 = arith.maximumf %6, %7 : vector<1x1024xf32>
    %c0_4 = arith.constant 0 : index
    %c0_5 = arith.constant 0 : index
    %9 = vector.load %arg3[%c0_4, %c0_5] : memref<1x1024xf32, #tpu.memory_space<vmem>>, vector<1x1024xf32>
    tpu.vector_store %arg3[%c0_4, %c0_5], %8 {strides = array<i32>} : memref<1x1024xf32, #tpu.memory_space<vmem>>, vector<1x1024xf32>,
    return
  }
  func.func @transform_0(%arg0: i32) -> (i32, i32) {
    %c0_i32 = arith.constant 0 : i32
    %c0_i32_0 = arith.constant 0 : i32
    return %arg0, %c0_i32 : i32, i32
  }
  func.func @transform_1(%arg0: i32) -> (i32, i32) {
    %c0_i32 = arith.constant 0 : i32
    %c0_i32_0 = arith.constant 0 : i32
    return %arg0, %c0_i32 : i32, i32
  }
  func.func @transform_2(%arg0: i32) -> (i32, i32) {
    %c0_i32 = arith.constant 0 : i32
    %c0_i32_0 = arith.constant 0 : i32
    return %arg0, %c0_i32 : i32, i32
  }
}

</mosaic_0001>

<bundles_post_ra>
// kernel: tpu_custom_call.1
= control target key start
LH: loop header
LB: loop body
LE: loop exit
PB: predicated region body
PF: predicated region fallthrough
CT: control target
= control target key end

     0   :  { %7 = vsyncpa [#allocation3], 0  ;;  %s160_s0 = inlined_call_operand.hbm [shape: f32[1,1024], index: 0, kind: input, shape index: {}]   ;;  %s161_s1 = inlined_call_operand.hbm [shape: f32[1,1024], index: 1, kind: input, shape index: {}]   ;;  %s162_s2 = inlined_call_operand.hbm [shape: f32[1,1024], index: 2, kind: output, shape index: {}]  }
   0x1   :  { %8 = vsyncpa [#allocation6], 0 }
   0x2   :  { %9 = vsyncpa [#allocation4], 0  ;;  %s133_s9 = smov [#allocation2]   ;;  %s134_s11 = smov [#allocation5]  }
   0x3   :  { %s16_s10 = sshll.u32 %s133_s9, 4  ;;  %s26_s12 = sshll.u32 %s134_s11, 4  ;;  %s17_s10 = int_to_ptr.vmem [resolvable:$true] %s16_s10  ;;  %s27_s12 = int_to_ptr.vmem [resolvable:$true] %s26_s12 }
   0x4   :  { %s75_s13 = scalar_lea.vmem %s17_s10, 128  ;;  %p80_p1 = scmp.lt.s32.totalorder %s17_s10, %s17_s10 }
   0x5   :  { %p76_p0 = scmp.ne.s32.totalorder %s17_s10, %s75_s13  ;;  %p81_p2 = scmp.lt.s32.totalorder %s75_s13, %s75_s13 }
   0x7   :  { %p82_p3 = por %p81_p2, %p80_p1 }
   0x9   :  { %p83_p4 = pnand %p82_p3, %p76_p0 }
   0xb   :  { %86 = shalt.err (!%p83_p4)
}
   0xc   :  { %19 = dma.hbm_to_vmem [thread:$0]  %s160_s0, 128, %s17_s10, [#allocation3]  }
   0xd   :  { %s95_s16 = scalar_lea.vmem %s27_s12, 128  ;;  %p100_p6 = scmp.lt.s32.totalorder %s27_s12, %s27_s12 }
   0xe   :  { %p96_p5 = scmp.ne.s32.totalorder %s27_s12, %s95_s16  ;;  %p101_p7 = scmp.lt.s32.totalorder %s95_s16, %s95_s16 }
  0x10   :  { %p102_p8 = por %p101_p7, %p100_p6 }
  0x12   :  { %p103_p9 = pnand %p102_p8, %p96_p5 }
  0x14   :  { %106 = shalt.err (!%p103_p9)
}
  0x15   :  { %29 = dma.hbm_to_vmem [thread:$0]  %s161_s1, 128, %s27_s12, [#allocation6]  }
  0x16   :  { %127 = dma.done.wait [#allocation3], 128  }
  0x17   :  { %128 = vsyncadd [#allocation3], 4294967168 }
  0x18   :  { %129 = dma.done.wait [#allocation6], 128  }
  0x19   :  { %130 = vsyncadd [#allocation6], 4294967168  ;;  %v36_v0 = vld [vmem:[#allocation2] sm:$0xff]  ;;  %v38_v1 = vld [vmem:[#allocation5] sm:$0xff]  ;;  %s135_s0 = smov [#allocation7]  }
  0x1a   :  { %63 = vtanh.f32 %v36_v0  ;;  %s50_s19 = sshll.u32 %s135_s0, 4  ;;  %s51_s19 = int_to_ptr.vmem [resolvable:$true] %s50_s19 }
  0x1b   :  { %65 = vtanh.f32 %v38_v1  ;;  %s107_s20 = scalar_lea.vmem %s51_s19, 128  ;;  %p112_p11 = scmp.lt.s32.totalorder %s51_s19, %s51_s19 }
  0x1c   :  { %p108_p10 = scmp.ne.s32.totalorder %s51_s19, %s107_s20  ;;  %p113_p12 = scmp.lt.s32.totalorder %s107_s20, %s107_s20 }
  0x1e   :  { %p114_p13 = por %p113_p12, %p112_p11 }
  0x20   :  { %p115_p0 = pnand %p114_p13, %p108_p10 }
  0x27   :  { %v64_v2 = vpop.eup %63 }
  0x28   :  { %v66_v3 = vpop.eup %65 }
  0x29   :  { %v40_v4 = vadd.f32 1.0, %v66_v3 }
  0x2b   :  { %v41_v5 = vsub.f32 %v40_v4, %v64_v2 }
  0x2d   :  { %v42_v6 = vmax.f32 %v41_v5, 0.0 }
  0x2f   :  { %43 = vst [vmem:[#allocation7] sm:$0xff] %v42_v6 }
  0x30   :  { %118 = shalt.err (!%p115_p0)
}
  0x31   :  { %53 = dma.vmem_to_hbm [thread:$0]  %s51_s19, 128, %s162_s2, [#allocation4]  }
  0x32   :  { %131 = dma.done.wait [#allocation4], 128  }
  0x33   :  { %132 = vsyncadd [#allocation4], 4294967168 }
  0x34   :  { %57 = vsyncpa [#allocation3], 1 }
  0x35   :  { %58 = vsyncpa [#allocation6], 1 }
  0x36   :  { %59 = vsyncpa [#allocation4], 1 }

</bundles_post_ra>
